<compile_context>
chip_gen: v5e
topology: v5e:2x2
jax: 0.10.0
libtpu: 0.0.40
codegen_flags: <defaults>
</compile_context>

<pallas_src>
import functools
import math

import jax
import jax.numpy as jnp
from jax import lax
from jax.experimental import pallas as pl
from jax.experimental.pallas import tpu as pltpu


def _round_up(x, m):
    return ((x + m - 1) // m) * m


def _cdiv(a, b):
    return (a + b - 1) // b


# ----------------------------- Pallas kernel --------------------------------
def _patch_embed_kernel(p_ref, w_ref, params_ref, o_ref, *, e_true, eps, precision):
    # p_ref:      (TM, K8)   im2col patches (bf16/f32); K aligned to sublane pack only
    # w_ref:      (K8, Ep)   projection weight; padded rows/cols are exactly 0
    # params_ref: (8, Ep)    f32; row0 = conv bias, row1 = LN gamma, row2 = LN beta
    # o_ref:      (TM, Ep)   out dtype (bf16 default); padded embed columns -> 0
    y = jnp.dot(p_ref[...], w_ref[...],
                preferred_element_type=jnp.float32, precision=precision)
    bias = params_ref[0:1, :]
    gamma = params_ref[1:2, :]
    beta = params_ref[2:3, :]
    y = y + bias  # padded weight/bias columns are 0 -> padded y columns stay 0

    inv_e = 1.0 / float(e_true)
    # Padded embed columns of y are exactly zero, so the sums over Ep equal the
    # sums over the true E; LayerNorm statistics divide by the true E.
    mean = jnp.sum(y, axis=-1, keepdims=True) * inv_e
    var = jnp.maximum(
        jnp.sum(y * y, axis=-1, keepdims=True) * inv_e - mean * mean, 0.0)
    y_hat = (y - mean) * lax.rsqrt(var + eps)
    # gamma/beta are 0 on padded columns -> padded output columns are 0.
    o_ref[...] = (y_hat * gamma + beta).astype(o_ref.dtype)


# ----------------------------- wrapper glue ----------------------------------
def _out_hw(H, W, kh, kw, stride, pad):
    Ho = (H + 2 * pad - kh) // stride + 1
    Wo = (W + 2 * pad - kw) // stride + 1
    return Ho, Wo


def _im2col_nhwc(x_nchw, kh, kw, stride, pad, k_aligned, dtype):
    """(B, C, H, W) -> patches (B*Ho*Wo, k_aligned) in (ki, kj, c) K-order."""
    B, C, H, W = x_nchw.shape
    Ho, Wo = _out_hw(H, W, kh, kw, stride, pad)
    # NHWC once, cast to the MXU dtype early to halve wrapper HBM traffic.
    xp = jnp.pad(x_nchw.transpose(0, 2, 3, 1).astype(dtype),
                 ((0, 0), (pad, pad), (pad, pad), (0, 0)))
    cols = []
    for ki in range(kh):
        for kj in range(kw):
            cols.append(xp[:, ki:ki + (Ho - 1) * stride + 1:stride,
                           kj:kj + (Wo - 1) * stride + 1:stride, :])
    K = kh * kw * C
    if k_aligned > K:  # tiny sublane-alignment pad only (NOT padded to 128)
        cols.append(jnp.zeros((B, Ho, Wo, k_aligned - K), dtype))
    patches = jnp.concatenate(cols, axis=-1).reshape(B * Ho * Wo, k_aligned)
    return patches, Ho, Wo


# VMEM budgets: v7x has 64 MiB physical / ~32 MiB default scoped; v5e/v6e 128 MiB.
_VMEM_LIMIT_BYTES = 32 * 1024 * 1024
_VMEM_TILE_BUDGET = 24 * 1024 * 1024  # headroom for Mosaic internal scratch
_TM_MAX = 2048


def _pick_tm(M, K8, E_pad, in_bytes, out_bytes):
    """Largest TM (multiple of 8) fitting the VMEM budget, even grid when >1."""
    # Double-buffered patches & output blocks, double-buffered constant weight
    # and params blocks, plus ~3 f32-sized temporaries for the LayerNorm math.
    # TODO(synk): pipeline_mode=pl.Buffered(1) on the constant weight/params
    #   specs would free one of their buffers and let TM grow further.
    fixed = 2 * K8 * E_pad * in_bytes + 2 * 8 * E_pad * 4
    per_row = 2 * K8 * in_bytes + 2 * E_pad * out_bytes + 3 * E_pad * 4
    tm = max(8, min(_TM_MAX, (_VMEM_TILE_BUDGET - fixed) // per_row))
    tm = (tm // 8) * 8
    if M <= tm:
        return _round_up(M, 8), 1
    n_steps = _cdiv(M, tm)
    if n_steps % 2:  # even grid -> both v7x TensorCores get equal work
        n_steps += 1
    tm = _round_up(_cdiv(M, n_steps), 8)
    return tm, n_steps


@functools.partial(jax.jit,
                   static_argnames=("stride", "padding", "mxu_dtype",
                                    "out_dtype", "precision"))
def _overlap_patch_embed_tokens(x, conv_w, conv_b, ln_w, ln_b, *,
                                stride, padding, mxu_dtype, out_dtype, precision):
    E, C, kh, kw = conv_w.shape
    B = x.shape[0]
    K = kh * kw * C
    in_bytes = jnp.dtype(mxu_dtype).itemsize
    out_bytes = jnp.dtype(out_dtype).itemsize
    # Align K only to the dtype sublane packing (NOT to 128); the kernel reads
    # the full K extent per block so Mosaic lane-pads in VMEM for free.
    k_align = 16 if in_bytes < 4 else 8
    K8 = _round_up(K, k_align)
    E_pad = E if E % 128 == 0 else _round_up(E, 128)

    patches, Ho, Wo = _im2col_nhwc(x, kh, kw, stride, padding, K8, mxu_dtype)
    # TODO(synk): fuse the im2col into the kernel (manual make_async_copy of kh
    #   row-strips from a padded NHWC input) to remove this HBM round trip.
    M = B * Ho * Wo

    TM, n_steps = _pick_tm(M, K8, E_pad, in_bytes, out_bytes)
    M_pad = TM * n_steps
    if M_pad > M:
        patches = jnp.pad(patches, ((0, M_pad - M), (0, 0)))

    # Weight in (ki, kj, c) K-order to match the NHWC im2col concat order.
    w_mat = conv_w.transpose(2, 3, 1, 0).reshape(K, E)
    w_mat = jnp.pad(w_mat, ((0, K8 - K), (0, E_pad - E))).astype(mxu_dtype)

    # conv bias / LN gamma / LN beta packed into one (8, E_pad) f32 block.
    params = jnp.zeros((8, E_pad), jnp.float32)
    params = params.at[0, :E].set(conv_b.astype(jnp.float32))
    params = params.at[1, :E].set(ln_w.astype(jnp.float32))
    params = params.at[2, :E].set(ln_b.astype(jnp.float32))

    cost = pl.CostEstimate(
        flops=2 * M_pad * K8 * E_pad,
        transcendentals=M_pad,
        bytes_accessed=(M_pad * K8 * in_bytes + K8 * E_pad * in_bytes
                        + 8 * E_pad * 4 + M_pad * E_pad * out_bytes))

    out = pl.pallas_call(
        functools.partial(_patch_embed_kernel, e_true=E, eps=1e-5,
                          precision=precision),
        out_shape=jax.ShapeDtypeStruct((M_pad, E_pad), out_dtype),
        grid_spec=pltpu.PrefetchScalarGridSpec(
            num_scalar_prefetch=0,
            grid=(n_steps,),
            in_specs=[
                pl.BlockSpec((TM, K8), lambda i: (i, 0)),
                pl.BlockSpec((K8, E_pad), lambda i: (0, 0)),
                pl.BlockSpec((8, E_pad), lambda i: (0, 0)),
            ],
            out_specs=pl.BlockSpec((TM, E_pad), lambda i: (i, 0)),
        ),
        compiler_params=pltpu.CompilerParams(
            dimension_semantics=("parallel",),
            vmem_limit_bytes=_VMEM_LIMIT_BYTES),
        cost_estimate=cost,
    )(patches, w_mat, params)

    if M_pad != M or E_pad != E:
        out = out[:M, :E]
    tokens = out.reshape(B, Ho * Wo, E)
    return tokens


def overlap_patch_embed(x, conv_w, conv_b, ln_w, ln_b, *, stride, padding,
                        mxu_dtype=jnp.bfloat16, out_dtype=jnp.bfloat16):
    """Forward pass of OverlapPatchEmbed. Returns (tokens, Ho, Wo)."""
    _, _, kh, kw = conv_w.shape
    Ho, Wo = _out_hw(x.shape[2], x.shape[3], kh, kw, stride, padding)
    precision = (lax.Precision.HIGHEST
                 if jnp.dtype(mxu_dtype) == jnp.dtype(jnp.float32) else None)
    tokens = _overlap_patch_embed_tokens(
        x, conv_w, conv_b, ln_w, ln_b,
        stride=stride, padding=padding, mxu_dtype=mxu_dtype,
        out_dtype=out_dtype, precision=precision)
    return tokens, Ho, Wo


# ----------------------------- reference (pure JAX) --------------------------
def _reference(x, conv_w, conv_b, ln_w, ln_b, *, stride, padding):
    y = lax.conv_general_dilated(
        x, conv_w, window_strides=(stride, stride),
        padding=((padding, padding), (padding, padding)),
        dimension_numbers=("NCHW", "OIHW", "NCHW"),
        precision=lax.Precision.HIGHEST)
    y = y + conv_b[None, :, None, None]
    B, E, Ho, Wo = y.shape
    t = y.reshape(B, E, Ho * Wo).transpose(0, 2, 1)        # (B, N, E)
    mean = jnp.mean(t, axis=-1, keepdims=True)
    var = jnp.mean(jnp.square(t - mean), axis=-1, keepdims=True)
    t = (t - mean) * lax.rsqrt(var + 1e-5) * ln_w + ln_b
    return t, Ho, Wo


if __name__ == "__main__":
    # Small shapes consistent with the module: B=2, C_in=4, 16x16 image,
    # patch_size=7, stride=4, padding=3, embed_dim=32.
    B, C, H, W = 2, 4, 16, 16
    patch_size, stride, padding, embed_dim = 7, 4, 3, 32

    key = jax.random.PRNGKey(0)
    kx, kw_ = jax.random.split(key)

    x = jax.random.normal(kx, (B, C, H, W), dtype=jnp.float32)

    # Deterministic parameter init mirroring _init_weights:
    fan_out = patch_size * patch_size * embed_dim
    conv_w = jax.random.normal(kw_, (embed_dim, C, patch_size, patch_size),
                               dtype=jnp.float32) * math.sqrt(2.0 / fan_out)
    conv_b = jnp.zeros((embed_dim,), jnp.float32)
    ln_w = jnp.ones((embed_dim,), jnp.float32)
    ln_b = jnp.zeros((embed_dim,), jnp.float32)

    ref, Ho_r, Wo_r = _reference(
        x, conv_w, conv_b, ln_w, ln_b, stride=stride, padding=padding)

    # f32 MXU path at HIGHEST precision: tight numerical check of the fused math.
    tok32, Ho, Wo = overlap_patch_embed(
        x, conv_w, conv_b, ln_w, ln_b, stride=stride, padding=padding,
        mxu_dtype=jnp.float32, out_dtype=jnp.float32)
    tok32 = jax.block_until_ready(tok32)
    assert (Ho, Wo) == (Ho_r, Wo_r)
    assert tok32.shape == (B, Ho * Wo, embed_dim)
    assert jnp.allclose(tok32, ref, atol=2e-3, rtol=2e-3)

    # Production path: bf16 MXU operands, f32 accumulation + LayerNorm,
    # bf16 output (downstream SegFormer block dtype).
    tok16, Ho2, Wo2 = overlap_patch_embed(
        x, conv_w, conv_b, ln_w, ln_b, stride=stride, padding=padding)
    tok16 = jax.block_until_ready(tok16)
    assert (Ho2, Wo2) == (Ho_r, Wo_r)
    assert tok16.shape == (B, Ho * Wo, embed_dim)
    assert tok16.dtype == jnp.bfloat16
    assert jnp.allclose(tok16.astype(jnp.float32), ref, atol=4e-2, rtol=4e-2)

    print("KERNEL_OK")
</pallas_src>

<mosaic_0001>
module attributes {stable_mosaic.version = 11 : i64} {
  func.func @_patch_embed_kernel(%arg0: i32, %arg1: memref<32x200xf32, #tpu.memory_space<vmem>>, %arg2: memref<200x128xf32, #tpu.memory_space<vmem>>, %arg3: memref<8x128xf32, #tpu.memory_space<vmem>>, %arg4: memref<32x128xf32, #tpu.memory_space<vmem>>) attributes {dimension_semantics = [#tpu.dimension_semantics<parallel>], iteration_bounds = array<i64: 1>, scalar_prefetch = 0 : i64, scratch_operands = 0 : i64, tpu.core_type = #tpu.core_type<tc>, window_params = [{transform_indices = @transform_0, window_bounds = array<i64: 32, 200>}, {pipeline_mode = #tpu.pipeline_mode<synchronous>, transform_indices = @transform_1, window_bounds = array<i64: 200, 128>}, {pipeline_mode = #tpu.pipeline_mode<synchronous>, transform_indices = @transform_2, window_bounds = array<i64: 8, 128>}, {transform_indices = @transform_3, window_bounds = array<i64: 32, 128>}]} {
    %c0 = arith.constant 0 : index
    %c0_0 = arith.constant 0 : index
    %0 = vector.load %arg1[%c0, %c0_0] : memref<32x200xf32, #tpu.memory_space<vmem>>, vector<32x200xf32>
    %c0_1 = arith.constant 0 : index
    %c0_2 = arith.constant 0 : index
    %1 = vector.load %arg2[%c0_1, %c0_2] : memref<200x128xf32, #tpu.memory_space<vmem>>, vector<200x128xf32>
    %cst = arith.constant dense<0.000000e+00> : vector<32x128xf32>
    %2 = tpu.matmul %0, %1, %cst {dimension_numbers = #tpu.dot_dimension_numbers<[1], [0], [0], [1], [0, 0, 1, 1], [], []>, precision = #tpu.contract_precision<fp32>} : vector<32x200xf32>, vector<200x128xf32>, vector<32x128xf32> -> vector<32x128xf32>
    %c0_3 = arith.constant 0 : index
    %c0_4 = arith.constant 0 : index
    %3 = vector.load %arg3[%c0_3, %c0_4] : memref<8x128xf32, #tpu.memory_space<vmem>>, vector<1x128xf32>
    %c1 = arith.constant 1 : index
    %c0_5 = arith.constant 0 : index
    %4 = vector.load %arg3[%c1, %c0_5] : memref<8x128xf32, #tpu.memory_space<vmem>>, vector<1x128xf32>
    %c2 = arith.constant 2 : index
    %c0_6 = arith.constant 0 : index
    %5 = vector.load %arg3[%c2, %c0_6] : memref<8x128xf32, #tpu.memory_space<vmem>>, vector<1x128xf32>
    %6 = vector.broadcast %3 : vector<1x128xf32> to vector<32x128xf32>
    %7 = arith.addf %2, %6 : vector<32x128xf32>
    %cst_7 = arith.constant dense<0.000000e+00> : vector<32xf32>
    %8 = vector.multi_reduction <add>, %7, %cst_7 [1] : vector<32x128xf32> to vector<32xf32>
    %9 = vector.shape_cast %8 : vector<32xf32> to vector<32x1xf32>
    %cst_8 = arith.constant 3.125000e-02 : f32
    %10 = vector.broadcast %cst_8 : f32 to vector<32x1xf32>
    %11 = arith.mulf %9, %10 : vector<32x1xf32>
    %12 = arith.mulf %7, %7 : vector<32x128xf32>
    %cst_9 = arith.constant dense<0.000000e+00> : vector<32xf32>
    %13 = vector.multi_reduction <add>, %12, %cst_9 [1] : vector<32x128xf32> to vector<32xf32>
    %14 = vector.shape_cast %13 : vector<32xf32> to vector<32x1xf32>
    %cst_10 = arith.constant 3.125000e-02 : f32
    %15 = vector.broadcast %cst_10 : f32 to vector<32x1xf32>
    %16 = arith.mulf %14, %15 : vector<32x1xf32>
    %17 = arith.mulf %11, %11 : vector<32x1xf32>
    %18 = arith.subf %16, %17 : vector<32x1xf32>
    %cst_11 = arith.constant 0.000000e+00 : f32
    %19 = vector.broadcast %cst_11 : f32 to vector<32x1xf32>
    %20 = arith.maximumf %18, %19 : vector<32x1xf32>
    %21 = vector.broadcast %11 : vector<32x1xf32> to vector<32x128xf32>
    %22 = arith.subf %7, %21 : vector<32x128xf32>
    %cst_12 = arith.constant 9.99999974E-6 : f32
    %23 = vector.broadcast %cst_12 : f32 to vector<32x1xf32>
    %24 = arith.addf %20, %23 : vector<32x1xf32>
    %25 = math.rsqrt %24 : vector<32x1xf32>
    %26 = vector.broadcast %25 : vector<32x1xf32> to vector<32x128xf32>
    %27 = arith.mulf %22, %26 : vector<32x128xf32>
    %28 = vector.broadcast %4 : vector<1x128xf32> to vector<32x128xf32>
    %29 = arith.mulf %27, %28 : vector<32x128xf32>
    %30 = vector.broadcast %5 : vector<1x128xf32> to vector<32x128xf32>
    %31 = arith.addf %29, %30 : vector<32x128xf32>
    %c0_13 = arith.constant 0 : index
    %c0_14 = arith.constant 0 : index
    %32 = vector.load %arg4[%c0_13, %c0_14] : memref<32x128xf32, #tpu.memory_space<vmem>>, vector<32x128xf32>
    tpu.vector_store %arg4[%c0_13, %c0_14], %31 {strides = array<i32>} : memref<32x128xf32, #tpu.memory_space<vmem>>, vector<32x128xf32>,
    return
  }
  func.func @transform_0(%arg0: i32) -> (i32, i32) {
    %c0_i32 = arith.constant 0 : i32
    %c0_i32_0 = arith.constant 0 : i32
    return %arg0, %c0_i32 : i32, i32
  }
  func.func @transform_1(%arg0: i32) -> (i32, i32) {
    %c0_i32 = arith.constant 0 : i32
    %c0_i32_0 = arith.constant 0 : i32
    %c0_i32_1 = arith.constant 0 : i32
    return %c0_i32, %c0_i32_0 : i32, i32
  }
  func.func @transform_2(%arg0: i32) -> (i32, i32) {
    %c0_i32 = arith.constant 0 : i32
    %c0_i32_0 = arith.constant 0 : i32
    %c0_i32_1 = arith.constant 0 : i32
    return %c0_i32, %c0_i32_0 : i32, i32
  }
  func.func @transform_3(%arg0: i32) -> (i32, i32) {
    %c0_i32 = arith.constant 0 : i32
    %c0_i32_0 = arith.constant 0 : i32
    return %arg0, %c0_i32 : i32, i32
  }
}

</mosaic_0001>

<bundles_post_ra>
// kernel: _overlap_patch_embed_tokens.1
= control target key start
LH: loop header
LB: loop body
LE: loop exit
PB: predicated region body
PF: predicated region fallthrough
CT: control target
= control target key end

     0   :  { %s1650_s0 = inlined_call_operand.vmem [shape: f32[32,200], index: 0, kind: input, shape index: {}]   ;;  %s1651_s1 = inlined_call_operand.vmem [shape: f32[200,128], index: 1, kind: input, shape index: {}]   ;;  %s1652_s2 = inlined_call_operand.vmem [shape: f32[8,128], index: 2, kind: input, shape index: {}]   ;;  %s1653_s3 = inlined_call_operand.hbm [shape: f32[32,128], index: 3, kind: output, shape index: {}]  }
   0x1   :  { %v38_v0 = vld [vmem:[%s1651_s1 + $0x78] sm:$0xff]  ;;  %v37_v1 = vld [vmem:[%s1651_s1 + $0x70] sm:$0xff]  ;;  %v36_v2 = vld [vmem:[%s1651_s1 + $0x68] sm:$0xff] }
   0x2   :  { %v1038_v3 = vand.u32 4294901760, %v38_v0  ;;  %v1040_v4 = vand.u32 4294901760, %v37_v1  ;;  %v1042_v5 = vand.u32 4294901760, %v36_v2  ;;  %v35_v6 = vld [vmem:[%s1651_s1 + $0x60] sm:$0xff]  ;;  %v34_v7 = vld [vmem:[%s1651_s1 + $0x58] sm:$0xff]  ;;  %v33_v8 = vld [vmem:[%s1651_s1 + $0x50] sm:$0xff] }
   0x3   :  { %v1053_v9 = vand.u32 4294901760, %v35_v6  ;;  %v1055_v10 = vand.u32 4294901760, %v34_v7  ;;  %v1057_v11 = vand.u32 4294901760, %v33_v8  ;;  %v32_v12 = vld [vmem:[%s1651_s1 + $0x48] sm:$0xff]  ;;  %v31_v13 = vld [vmem:[%s1651_s1 + $0x40] sm:$0xff]  ;;  %v30_v18 = vld [vmem:[%s1651_s1 + $0x38] sm:$0xff] }
   0x4   :  { %66 = vmatpush.msra.mxu0 %v1038_v3  ;;  %v1067_v14 = vsub.f32 %v38_v0, %v1038_v3  ;;  %v1070_v15 = vsub.f32 %v37_v1, %v1040_v4  ;;  %313 = vmatpush.msra.mxu3 %v1038_v3  ;;  %v1074_v16 = vsub.f32 %v36_v2, %v1042_v5  ;;  %v1076_v17 = vand.u32 4294901760, %v32_v12  ;;  %v29_v29 = vld [vmem:[%s1651_s1 + $0x30] sm:$0xff]  ;;  %v28_v36 = vld [vmem:[%s1651_s1 + $0x28] sm:$0xff] }
   0x5   :  { %v1082_v19 = vsub.f32 %v35_v6, %v1053_v9  ;;  %v1085_v20 = vsub.f32 %v34_v7, %v1055_v10  ;;  %v1087_v21 = vand.u32 4294901760, %v31_v13  ;;  %v1090_v22 = vsub.f32 %v33_v8, %v1057_v11 }
   0x6   :  { %68 = vmatpush.msra.mxu0 %v1040_v4  ;;  %245 = vmatpush.msra.mxu2 %v1067_v14  ;;  %v132_v23 = vand.u32 4294901760, %v1067_v14  ;;  %v138_v24 = vand.u32 4294901760, %v1070_v15  ;;  %v1666_v25 = vand.u32 4294901760, %v1074_v16  ;;  %v1099_v27 = vand.u32 4294901760, %v30_v18 }
   0x7   :  { %315 = vmatpush.msra.mxu3 %v1040_v4  ;;  %v1665_v26 = vand.u32 4294901760, %v1082_v19  ;;  %v1102_v28 = vsub.f32 %v32_v12, %v1076_v17  ;;  %v1664_v33 = vand.u32 4294901760, %v1085_v20  ;;  %v1662_v34 = vand.u32 4294901760, %v1090_v22 }
   0x8   :  { %70 = vmatpush.msra.mxu0 %v1042_v5  ;;  %248 = vmatpush.msra.mxu2 %v1070_v15  ;;  %v133_v30 = vsub.f32 %v1067_v14, %v132_v23  ;;  %v139_v31 = vsub.f32 %v1070_v15, %v138_v24  ;;  %v145_v32 = vsub.f32 %v1074_v16, %v1666_v25 }
   0x9   :  { %317 = vmatpush.msra.mxu3 %v1042_v5  ;;  %v1122_v35 = vsub.f32 %v31_v13, %v1087_v21 }
   0xa   :  { %8 = vsyncpa [#allocation3], 0  ;;  %72 = vmatpush.msra.mxu0 %v1053_v9  ;;  %v134_v37 = vand.u32 4294901760, %v133_v30  ;;  %251 = vmatpush.msra.mxu2 %v1074_v16  ;;  %v140_v38 = vand.u32 4294901760, %v139_v31  ;;  %v151_v39 = vsub.f32 %v1082_v19, %v1665_v26  ;;  %v1132_v40 = vand.u32 4294901760, %v29_v29  ;;  %v27_v43 = vld [vmem:[%s1651_s1 + $0x20] sm:$0xff] }
   0xb   :  { %319 = vmatpush.msra.mxu3 %v1053_v9  ;;  %v1661_v41 = vand.u32 4294901760, %v1102_v28  ;;  %v1137_v42 = vsub.f32 %v30_v18, %v1099_v27  ;;  %v146_v44 = vand.u32 4294901760, %v145_v32  ;;  %v157_v45 = vsub.f32 %v1085_v20, %v1664_v33  ;;  %v26_v49 = vld [vmem:[%s1651_s1 + $0x18] sm:$0xff]  ;;  %v25_v55 = vld [vmem:[%s1651_s1 + $0x10] sm:$0xff]  ;;  %v15_v56 = vld [vmem:[%s1650_s0] sm:$0xff]  ;;  %s954_s4 = sshll.u32 %s1653_s3, 4  ;;  %s955_s4 = int_to_ptr.hbm [resolvable:$true] %s954_s4 }
   0xc   :  { %74 = vmatpush.msra.mxu0 %v1055_v10  ;;  %135 = vmatpush.msra.mxu1 %v134_v37  ;;  %v1146_v46 = vand.u32 4294901760, %v28_v36  ;;  %v163_v47 = vsub.f32 %v1090_v22, %v1662_v34  ;;  %v1659_v48 = vand.u32 4294901760, %v1122_v35  ;;  %v152_v50 = vand.u32 4294901760, %v151_v39  ;;  %v24_v62 = vld [vmem:[%s1651_s1 + $0x8] sm:$0xff]  ;;  %v47_v6 = vld [vmem:[%s1651_s1 + $0xc0] sm:$0xff]  ;;  %s1007_s5 = smov 128  }
   0xd   :  { %254 = vmatpush.msra.mxu2 %v1082_v19  ;;  %321 = vmatpush.msra.mxu3 %v1055_v10  ;;  %v1158_v51 = vand.u32 4294901760, %v27_v43  ;;  %v1161_v52 = vsub.f32 %v29_v29, %v1132_v40  ;;  %v169_v53 = vsub.f32 %v1102_v28, %v1661_v41  ;;  %v1658_v54 = vand.u32 4294901760, %v1137_v42  ;;  %v23_v12 = vld [vmem:[%s1651_s1] sm:$0xff]  ;;  %s1008_s6 = smov 8  }
   0xe   :  { %76 = vmatpush.msra.mxu0 %v1057_v11  ;;  %141 = vmatpush.msra.mxu1 %v140_v38  ;;  %v158_v57 = vand.u32 4294901760, %v157_v45  ;;  %v1176_v58 = vand.u32 4294901760, %v26_v49  ;;  %v1179_v59 = vsub.f32 %v28_v36, %v1146_v46  ;;  %v164_v60 = vand.u32 4294901760, %v163_v47  ;;  %v17_v36 = vld [vmem:[%s1650_s0 + $0x10] sm:$0xff]  ;;  %v43_v34 = vld [vmem:[%s1651_s1 + $0xa0] sm:$0xff] }
   0xf   :  { %257 = vmatpush.msra.mxu2 %v1085_v20  ;;  %323 = vmatpush.msra.mxu3 %v1057_v11  ;;  %v175_v61 = vsub.f32 %v1122_v35, %v1659_v48  ;;  %v1190_v63 = vand.u32 4294901760, %v25_v55  ;;  %v1656_v0 = vand.u32 4294901760, %v1161_v52  ;;  %v1194_v1 = vsub.f32 %v27_v43, %v1158_v51 }
  0x10   :  { %78 = vmatpush.msra.mxu0 %v1076_v17  ;;  %147 = vmatpush.msra.mxu1 %v146_v44  ;;  %v1196_v2 = vand.u32 4294901760, %v15_v56  ;;  %v170_v7 = vand.u32 4294901760, %v169_v53  ;;  %v181_v8 = vsub.f32 %v1137_v42, %v1658_v54  ;;  %v1210_v13 = vand.u32 4294901760, %v24_v62  ;;  %v46_v44 = vld [vmem:[%s1651_s1 + $0xb8] sm:$0xff] }
  0x11   :  { %260 = vmatpush.msra.mxu2 %v1090_v22  ;;  %325 = vmatpush.msra.mxu3 %v1076_v17  ;;  %v1655_v18 = vand.u32 4294901760, %v1179_v59  ;;  %v1214_v29 = vsub.f32 %v26_v49, %v1176_v58  ;;  %v176_v31 = vand.u32 4294901760, %v175_v61  ;;  %v1221_v32 = vand.u32 4294901760, %v47_v6 }
  0x12   :  { %80 = vmatpush.msra.mxu0 %v1087_v21  ;;  %153 = vmatpush.msra.mxu1 %v152_v50  ;;  %v1217_v30 = vsub.f32 %v15_v56, %v1196_v2  ;;  %v187_v37 = vsub.f32 %v1161_v52, %v1656_v0  ;;  %v1230_v38 = vand.u32 4294901760, %v23_v12  ;;  %v1654_v39 = vand.u32 4294901760, %v1194_v1 }
  0x13   :  { %263 = vmatpush.msra.mxu2 %v1102_v28  ;;  %327 = vmatpush.msra.mxu3 %v1087_v21  ;;  %v1234_v43 = vsub.f32 %v25_v55, %v1190_v63  ;;  %v182_v45 = vand.u32 4294901760, %v181_v8  ;;  %v193_v49 = vsub.f32 %v1179_v59, %v1655_v18  ;;  %v1657_v50 = vand.u32 4294901760, %v1214_v29 }
  0x14   :  { %82 = vmatpush.msra.mxu0 %v1099_v27  ;;  %159 = vmatpush.msra.mxu1 %v158_v57  ;;  %v99_v47 = vand.u32 4294901760, %v1217_v30  ;;  %v1248_v53 = vsub.f32 %v24_v62, %v1210_v13  ;;  %v1250_v55 = vand.u32 4294901760, %v17_v36  ;;  %v1255_v56 = vsub.f32 %v47_v6, %v1221_v32  ;;  %v45_v6 = vld [vmem:[%s1651_s1 + $0xb0] sm:$0xff] }
  0x15   :  { %266 = vmatpush.msra.mxu2 %v1122_v35  ;;  %329 = vmatpush.msra.mxu3 %v1099_v27  ;;  %v1257_v57 = vand.u32 4294901760, %v46_v44  ;;  %v199_v61 = vsub.f32 %v1194_v1, %v1654_v39  ;;  %v1660_v62 = vand.u32 4294901760, %v1234_v43  ;;  %v1330_v25 = vand.u32 4294901760, %v43_v34 }
  0x16   :  { %84 = vmatpush.msra.mxu0 %v1132_v40  ;;  %165 = vmatpush.msra.mxu1 %v164_v60  ;;  %v188_v60 = vand.u32 4294901760, %v187_v37  ;;  %v100_v8 = vsub.f32 %v1217_v30, %v99_v47  ;;  %v1663_v37 = vand.u32 4294901760, %v1248_v53  ;;  %v1281_v39 = vsub.f32 %v17_v36, %v1250_v55 }
  0x17   :  { %269 = vmatpush.msra.mxu2 %v1137_v42  ;;  %331 = vmatpush.msra.mxu3 %v1132_v40  ;;  %v1667_v18 = vand.u32 4294901760, %v1255_v56  ;;  %v1287_v0 = vsub.f32 %v46_v44, %v1257_v57  ;;  %v200_v36 = vand.u32 4294901760, %v199_v61  ;;  %v44_v44 = vld [vmem:[%s1651_s1 + $0xa8] sm:$0xff]  ;;  %vm52_vm0 = vcmask 588800  }
  0x18   :  { %86 = vmatpush.msra.mxu0 %v1146_v46  ;;  %171 = vmatpush.msra.mxu1 %v170_v7  ;;  %v1265_v7 = vsub.f32 %v23_v12, %v1230_v38  ;;  %v205_v12 = vsub.f32 %v1214_v29, %v1657_v50  ;;  %v211_v50 = vsub.f32 %v1234_v43, %v1660_v62  ;;  %v101_v48 = vand.u32 4294901760, %v100_v8 }
  0x19   :  { %272 = vmatpush.msra.mxu2 %v1161_v52  ;;  %333 = vmatpush.msra.mxu3 %v1146_v46  ;;  %v217_v61 = vsub.f32 %v1248_v53, %v1663_v37  ;;  %v107_v62 = vand.u32 4294901760, %v1281_v39  ;;  %v567_v8 = vsub.f32 %v1255_v56, %v1667_v18  ;;  %v1323_v37 = vand.u32 4294901760, %v44_v44 }
  0x1a   :  { %88 = vmatpush.msra.mxu0 %v1158_v51  ;;  %177 = vmatpush.msra.mxu1 %v176_v31  ;;  %v194_v31 = vand.u32 4294901760, %v193_v49  ;;  %v19_v49 = vld [vmem:[%s1650_s0 + $0x20] sm:$0xff]  ;;  %v222_v54 = vand.u32 4294901760, %v1265_v7  ;;  %v212_v33 = vand.u32 4294901760, %v211_v50 }
  0x1b   :  { %275 = vmatpush.msra.mxu2 %v1179_v59  ;;  %335 = vmatpush.msra.mxu3 %v1158_v51  ;;  %v1309_v41 = vand.u32 4294901760, %v19_v49  ;;  %v108_v18 = vsub.f32 %v1281_v39, %v107_v62 }
  0x1c   :  { %90 = vmatpush.msra.mxu0 %v1176_v58  ;;  %183 = vmatpush.msra.mxu1 %v182_v45  ;;  %v1289_v45 = vand.u32 4294901760, %v45_v6  ;;  %v223_v26 = vsub.f32 %v1265_v7, %v222_v54 }
  0x1d   :  { %278 = vmatpush.msra.mxu2 %v1194_v1  ;;  %337 = vmatpush.msra.mxu3 %v1176_v58  ;;  %v1338_v50 = vsub.f32 %v19_v49, %v1309_v41 }
  0x1e   :  { %92 = vmatpush.msra.mxu0 %v1190_v63  ;;  %189 = vmatpush.msra.mxu1 %v188_v60  ;;  %v206_v60 = vand.u32 4294901760, %v205_v12  ;;  %v1321_v12 = vsub.f32 %v45_v6, %v1289_v45  ;;  %v218_v6 = vand.u32 4294901760, %v217_v61  ;;  %v224_v49 = vand.u32 4294901760, %v223_v26  ;;  %v42_v61 = vld [vmem:[%s1651_s1 + $0x98] sm:$0xff] }
  0x1f   :  { %281 = vmatpush.msra.mxu2 %v1214_v29  ;;  %339 = vmatpush.msra.mxu3 %v1190_v63  ;;  %v115_v15 = vand.u32 4294901760, %v1338_v50  ;;  %v1671_v26 = vand.u32 4294901760, %v1074_v16  ;;  %v1672_v16 = vand.u32 4294901760, %v1082_v19  ;;  %v40_v19 = vld [vmem:[%s1651_s1 + $0x88] sm:$0xff] }
  0x20   :  { %94 = vmatpush.msra.mxu0 %v1210_v13  ;;  %195 = vmatpush.msra.mxu1 %v194_v31  ;;  %v572_v31 = vand.u32 4294901760, %v1287_v0  ;;  %v1670_v14 = vand.u32 4294901760, %v1321_v12 }
  0x21   :  { %284 = vmatpush.msra.mxu2 %v1234_v43  ;;  %341 = vmatpush.msra.mxu3 %v1210_v13 }
  0x22   :  { %96 = vmatpush.msra.mxu0 %v1230_v38  ;;  %201 = vmatpush.msra.mxu1 %v200_v36  ;;  %v573_v36 = vsub.f32 %v1287_v0, %v572_v31 }
  0x23   :  { %102 = vmatmul.f32.vlgmr.msra.gmra.mxu0 %v101_v48  ;;  %287 = vmatpush.msra.mxu2 %v1248_v53  ;;  %v568_v48 = vand.u32 4294901760, %v567_v8 }
  0x24   :  { %207 = vmatpush.msra.mxu1 %v206_v60  ;;  %372 = vmatpush.msrb.mxu0 %v132_v23  ;;  %v1347_v23 = vsub.f32 %v44_v44, %v1323_v37  ;;  %v21_v60 = vld [vmem:[%s1650_s0 + $0x30] sm:$0xff]  ;;  %v1361_v44 = vsub.f32 %v43_v34, %v1330_v25  ;;  %v574_v8 = vand.u32 4294901760, %v573_v36 }
  0x25   :  { %290 = vmatpush.msra.mxu2 %v1265_v7  ;;  %343 = vmatpush.msra.mxu3 %v1230_v38 }
  0x26   :  { %213 = vmatpush.msra.mxu1 %v212_v33  ;;  %376 = vmatpush.msrb.mxu0 %v138_v24  ;;  %v109_v33 = vand.u32 4294901760, %v108_v18  ;;  %v1365_v24 = vand.u32 4294901760, %v21_v60  ;;  %v1669_v34 = vand.u32 4294901760, %v1347_v23  ;;  %v41_v18 = vld [vmem:[%s1651_s1 + $0x90] sm:$0xff] }
  0x27   :  { %293 = vmatmul.f32.vlgmr.msra.gmra.mxu2 %v1217_v30  ;;  %347 = vmatmul.f32.vlgmr.msra.gmra.mxu3 %v99_v47  ;;  %v579_v30 = vsub.f32 %v1321_v12, %v1670_v14  ;;  %v1373_v47 = vand.u32 4294901760, %v42_v61 }
  0x28   :  { %507 = vmatpush.msrb.mxu2 %v1221_v32  ;;  %219 = vmatpush.msra.mxu1 %v218_v6  ;;  %v1668_v6 = vand.u32 4294901760, %v1361_v44  ;;  %v1388_v36 = vsub.f32 %v21_v60, %v1365_v24  ;;  %v16_v60 = vld [vmem:[%s1650_s0 + $0x8] sm:$0xff] }
  0x29   :  { %380 = vmatpush.msrb.mxu0 %v1671_v26  ;;  %569 = vmatpush.msrb.mxu3 %v568_v48  ;;  %v116_v48 = vsub.f32 %v1338_v50, %v115_v15  ;;  %v1673_v26 = vand.u32 4294901760, %v1085_v20  ;;  %v1674_v20 = vand.u32 4294901760, %v1090_v22 }
  0x2a   :  { %225 = vmatpush.msra.mxu1 %v224_v49  ;;  %509 = vmatpush.msrb.mxu2 %v1257_v57  ;;  %v1390_v49 = vand.u32 4294901760, %v41_v18  ;;  %v123_v22 = vand.u32 4294901760, %v1388_v36 }
  0x2b   :  { %384 = vmatpush.msrb.mxu0 %v1672_v16  ;;  %227 = vmatmul.f32.vlgmr.msra.gmra.mxu1 %v1196_v2  ;;  %v1401_v16 = vsub.f32 %v42_v61, %v1373_v47  ;;  %v1414_v61 = vand.u32 4294901760, %v40_v19 }
  0x2c   :  { %110 = vmatmul.f32.gmra.mxu0 %v109_v33  ;;  %451 = vmatpush.msrb.mxu1 %v1038_v3  ;;  %v580_v33 = vand.u32 4294901760, %v579_v30  ;;  %v585_v3 = vsub.f32 %v1347_v23, %v1669_v34  ;;  %v39_v30 = vld [vmem:[%s1651_s1 + $0x80] sm:$0xff] }
  0x2d   :  { %388 = vmatpush.msrb.mxu0 %v1673_v26  ;;  %575 = vmatpush.msrb.mxu3 %v574_v8  ;;  %v591_v8 = vsub.f32 %v1361_v44, %v1668_v6  ;;  %v1424_v26 = vsub.f32 %v41_v18, %v1390_v49  ;;  %v1675_v6 = vand.u32 4294901760, %v1102_v28  ;;  %v596_v14 = vand.u32 4294901760, %v1401_v16 }
  0x2e   :  { %453 = vmatpush.msrb.mxu1 %v1040_v4  ;;  %511 = vmatpush.msrb.mxu2 %v1289_v45  ;;  %v117_v4 = vand.u32 4294901760, %v116_v48  ;;  %v586_v34 = vand.u32 4294901760, %v585_v3 }
  0x2f   :  { %392 = vmatpush.msrb.mxu0 %v1674_v20  ;;  %298 = vmatmul.f32.gmra.mxu2 %v1281_v39  ;;  %v54_v20 = vsel %vm52_vm0, %v16_v60, 0  ;;  %v1676_v39 = vand.u32 4294901760, %v1122_v35  ;;  %v592_v18 = vand.u32 4294901760, %v591_v8  ;;  %v1677_v35 = vand.u32 4294901760, %v1137_v42 }
  0x30   :  { %455 = vmatpush.msrb.mxu1 %v1042_v5  ;;  %353 = vmatmul.f32.gmra.mxu3 %v107_v62  ;;  %v1432_v5 = vand.u32 4294901760, %v39_v30  ;;  %v1438_v62 = vsub.f32 %v40_v19, %v1414_v61  ;;  %v1440_v28 = vand.u32 4294901760, %v54_v20  ;;  %v597_v48 = vsub.f32 %v1401_v16, %v596_v14  ;;  %v18_v19 = vld [vmem:[%s1650_s0 + $0x18] sm:$0xff] }
  0x31   :  { %396 = vmatpush.msrb.mxu0 %v1675_v6  ;;  %581 = vmatpush.msrb.mxu3 %v580_v33  ;;  %v602_v6 = vand.u32 4294901760, %v1424_v26  ;;  %v1678_v33 = vand.u32 4294901760, %v1161_v52  ;;  %v57_v60 = vsel %vm52_vm0, %v18_v19, 0  ;;  %v1679_v52 = vand.u32 4294901760, %v1179_v59 }
  0x32   :  { %457 = vmatpush.msrb.mxu1 %v1053_v9  ;;  %513 = vmatpush.msrb.mxu2 %v1323_v37  ;;  %v124_v9 = vsub.f32 %v1388_v36, %v123_v22  ;;  %v608_v42 = vand.u32 4294901760, %v1438_v62  ;;  %v598_v8 = vand.u32 4294901760, %v597_v48 }
  0x33   :  { %400 = vmatpush.msrb.mxu0 %v1676_v39  ;;  %231 = vmatmul.f32.gmra.mxu1 %v1250_v55  ;;  %v1682_v39 = vand.u32 4294901760, %v1234_v43 }
  0x34   :  { %118 = vmatmul.f32.gmra.mxu0 %v117_v4  ;;  %459 = vmatpush.msrb.mxu1 %v1055_v10  ;;  %v1458_v10 = vsub.f32 %v39_v30, %v1432_v5  ;;  %v125_v3 = vand.u32 4294901760, %v124_v9  ;;  %v1680_v30 = vand.u32 4294901760, %v1194_v1  ;;  %v609_v59 = vsub.f32 %v1438_v62, %v608_v42  ;;  %v20_v1 = vld [vmem:[%s1650_s0 + $0x28] sm:$0xff] }
  0x35   :  { %404 = vmatpush.msrb.mxu0 %v1677_v35  ;;  %587 = vmatpush.msrb.mxu3 %v586_v34  ;;  %v1465_v34 = vsub.f32 %v54_v20, %v1440_v28  ;;  %v1683_v9 = vand.u32 4294901760, %v1248_v53 }
  0x36   :  { %461 = vmatpush.msrb.mxu1 %v1057_v11  ;;  %515 = vmatpush.msrb.mxu2 %v1330_v25  ;;  %v603_v11 = vsub.f32 %v1424_v26, %v602_v6 }
  0x37   :  { %408 = vmatpush.msrb.mxu0 %v1678_v33  ;;  %303 = vmatmul.f32.gmra.mxu2 %v1338_v50  ;;  %v526_v4 = vand.u32 4294901760, %v1465_v34  ;;  %v1486_v50 = vand.u32 4294901760, %v57_v60 }
  0x38   :  { %463 = vmatpush.msrb.mxu1 %v1076_v17  ;;  %593 = vmatpush.msrb.mxu3 %v592_v18  ;;  %v614_v17 = vand.u32 4294901760, %v1458_v10 }
  0x39   :  { %412 = vmatpush.msrb.mxu0 %v1679_v52  ;;  %359 = vmatmul.f32.gmra.mxu3 %v115_v15  ;;  %v1681_v15 = vand.u32 4294901760, %v1214_v29  ;;  %v527_v29 = vsub.f32 %v1465_v34, %v526_v4  ;;  %v1506_v18 = vsub.f32 %v57_v60, %v1486_v50 }
  0x3a   :  { %465 = vmatpush.msrb.mxu1 %v1087_v21  ;;  %517 = vmatpush.msrb.mxu2 %v1373_v47  ;;  %v604_v21 = vand.u32 4294901760, %v603_v11  ;;  %v615_v20 = vsub.f32 %v1458_v10, %v614_v17 }
  0x3b   :  { %416 = vmatpush.msrb.mxu0 %v1680_v30  ;;  %235 = vmatmul.f32.gmra.mxu1 %v1309_v41  ;;  %v528_v35 = vand.u32 4294901760, %v527_v29 }
  0x3c   :  { %126 = vmatmul.f32.gmra.mxu0 %v125_v3  ;;  %467 = vmatpush.msrb.mxu1 %v1099_v27  ;;  %v610_v27 = vand.u32 4294901760, %v609_v59  ;;  %v616_v43 = vand.u32 4294901760, %v615_v20 }
  0x3d   :  { %599 = vmatpush.msrb.mxu3 %v598_v8  ;;  %420 = vmatpush.msrb.mxu0 %v1681_v15 }
  0x3e   :  { %469 = vmatpush.msrb.mxu1 %v1132_v40  ;;  %519 = vmatpush.msrb.mxu2 %v1390_v49  ;;  %v60_v40 = vsel %vm52_vm0, %v20_v1, 0 }
  0x3f   :  { %424 = vmatpush.msrb.mxu0 %v1682_v39  ;;  %308 = vmatmul.f32.gmra.mxu2 %v1388_v36  ;;  %v1519_v48 = vand.u32 4294901760, %v60_v40 }
  0x40   :  { %471 = vmatpush.msrb.mxu1 %v1146_v46  ;;  %605 = vmatpush.msrb.mxu3 %v604_v21  ;;  %v534_v46 = vand.u32 4294901760, %v1506_v18 }
  0x41   :  { %428 = vmatpush.msrb.mxu0 %v1683_v9  ;;  %521 = vmatpush.msrb.mxu2 %v1414_v61  ;;  %v1535_v7 = vsub.f32 %v60_v40, %v1519_v48 }
  0x42   :  { %365 = vmatmul.f32.gmra.mxu3 %v123_v22  ;;  %473 = vmatpush.msrb.mxu1 %v1158_v51  ;;  %v22_v51 = vld [vmem:[%s1650_s0 + $0x38] sm:$0xff]  ;;  %v535_v53 = vsub.f32 %v1506_v18, %v534_v46 }
  0x43   :  { %432 = vmatpush.msrb.mxu0 %v222_v54  ;;  %611 = vmatpush.msrb.mxu3 %v610_v27  ;;  %v1684_v54 = vand.u32 4294901760, %v1255_v56 }
  0x44   :  { %239 = vmatmul.f32.gmra.mxu1 %v1365_v24  ;;  %434 = vmatmul.f32.vlgmr.msrb.gmra.mxu0 %v1196_v2 }
  0x45   :  { %475 = vmatpush.msrb.mxu1 %v1176_v58  ;;  %523 = vmatpush.msrb.mxu2 %v1432_v5  ;;  %v63_v58 = vsel %vm52_vm0, %v22_v51, 0 }
  0x46   :  { %617 = vmatpush.msrb.mxu3 %v616_v43  ;;  %644 = vmatpush.msra.mxu0 %v1255_v56  ;;  %v542_v56 = vand.u32 4294901760, %v1535_v7  ;;  %v1548_v36 = vand.u32 4294901760, %v63_v58 }
  0x47   :  { %750 = vmatpush.msra.mxu2 %v1684_v54  ;;  %477 = vmatpush.msrb.mxu1 %v1190_v63  ;;  %v536_v63 = vand.u32 4294901760, %v535_v53 }
  0x48   :  { %529 = vmatmul.f32.vlgmr.msrb.gmra.mxu2 %v528_v35  ;;  %808 = vmatpush.msra.mxu3 %v1221_v32 }
  0x49   :  { %479 = vmatpush.msrb.mxu1 %v1210_v13  ;;  %754 = vmatpush.msra.mxu2 %v572_v31  ;;  %v1685_v13 = vand.u32 4294901760, %v1321_v12  ;;  %v1686_v31 = vand.u32 4294901760, %v1347_v23 }
  0x4a   :  { %619 = vmatmul.f32.vlgmr.msrb.gmra.mxu3 %v1440_v28  ;;  %647 = vmatpush.msra.mxu0 %v1287_v0  ;;  %v543_v0 = vsub.f32 %v1535_v7, %v542_v56 }
  0x4b   :  { %481 = vmatpush.msrb.mxu1 %v1230_v38  ;;  %810 = vmatpush.msra.mxu3 %v1257_v57  ;;  %v549_v38 = vsub.f32 %v63_v58, %v1548_v36 }
  0x4c   :  { %438 = vmatmul.f32.gmra.mxu0 %v1250_v55  ;;  %483 = vmatmul.f32.vlgmr.msrb.gmra.mxu1 %v1196_v2  ;;  %v1687_v2 = vand.u32 4294901760, %v1361_v44 }
  0x4d   :  { %698 = vmatpush.msra.mxu1 %v1221_v32  ;;  %758 = vmatpush.msra.mxu2 %v1685_v13  ;;  %v544_v32 = vand.u32 4294901760, %v543_v0 }
  0x4e   :  { %650 = vmatpush.msra.mxu0 %v1321_v12  ;;  %812 = vmatpush.msra.mxu3 %v1289_v45 }
  0x4f   :  { %700 = vmatpush.msra.mxu1 %v1257_v57  ;;  %762 = vmatpush.msra.mxu2 %v1686_v31  ;;  %v550_v57 = vand.u32 4294901760, %v549_v38 }
  0x50   :  { %537 = vmatmul.f32.gmra.mxu2 %v536_v63  ;;  %653 = vmatpush.msra.mxu0 %v1347_v23 }
  0x51   :  { %702 = vmatpush.msra.mxu1 %v1289_v45  ;;  %814 = vmatpush.msra.mxu3 %v1323_v37 }
  0x52   :  { %623 = vmatmul.f32.gmra.mxu3 %v1486_v50  ;;  %766 = vmatpush.msra.mxu2 %v1687_v2 }
  0x53   :  { %704 = vmatpush.msra.mxu1 %v1323_v37  ;;  %656 = vmatpush.msra.mxu0 %v1361_v44  ;;  %v551_v37 = vsub.f32 %v549_v38, %v550_v57 }
  0x54   :  { %442 = vmatmul.f32.gmra.mxu0 %v1309_v41  ;;  %487 = vmatmul.f32.gmra.mxu1 %v1250_v55 }
  0x55   :  { %816 = vmatpush.msra.mxu3 %v1330_v25  ;;  %770 = vmatpush.msra.mxu2 %v596_v14 }
  0x56   :  { %706 = vmatpush.msra.mxu1 %v1330_v25  ;;  %659 = vmatpush.msra.mxu0 %v1401_v16  ;;  %v552_v25 = vand.u32 4294901760, %v551_v37 }
  0x57   :  { %818 = vmatpush.msra.mxu3 %v1373_v47  ;;  %774 = vmatpush.msra.mxu2 %v602_v6 }
  0x58   :  { %545 = vmatmul.f32.gmra.mxu2 %v544_v32  ;;  %708 = vmatpush.msra.mxu1 %v1373_v47 }
  0x59   :  { %662 = vmatpush.msra.mxu0 %v1424_v26  ;;  %820 = vmatpush.msra.mxu3 %v1390_v49 }
  0x5a   :  { %627 = vmatmul.f32.gmra.mxu3 %v1519_v48  ;;  %778 = vmatpush.msra.mxu2 %v608_v42 }
  0x5b   :  { %665 = vmatpush.msra.mxu0 %v1438_v62  ;;  %710 = vmatpush.msra.mxu1 %v1390_v49 }
  0x5c   :  { %446 = vmatmul.f32.gmra.mxu0 %v1365_v24  ;;  %491 = vmatmul.f32.gmra.mxu1 %v1309_v41 }
  0x5d   :  { %668 = vmatpush.msra.mxu0 %v1458_v10  ;;  %822 = vmatpush.msra.mxu3 %v1414_v61  ;;  %v969_v10 = vld [vmem:[%s1652_s2] ss:$0 sm:$0xff] }
  0x5e   :  { %712 = vmatpush.msra.mxu1 %v1414_v61  ;;  %782 = vmatpush.msra.mxu2 %v614_v17 }
  0x5f   :  { %824 = vmatpush.msra.mxu3 %v1432_v5 }
  0x60   :  { %553 = vmatmul.f32.gmra.mxu2 %v552_v25  ;;  %714 = vmatpush.msra.mxu1 %v1432_v5 }
  0x62   :  { %631 = vmatmul.f32.gmra.mxu3 %v1548_v36 }
  0x64   :  { %495 = vmatmul.f32.gmra.mxu1 %v1365_v24  ;;  %671 = vmatmul.f32.vlgmr.msra.gmra.mxu0 %v1465_v34 }
  0x68   :  { %784 = vmatmul.f32.vlgmr.msra.gmra.mxu2 %v1440_v28 }
  0x6a   :  { %826 = vmatmul.f32.vlgmr.msra.gmra.mxu3 %v1440_v28 }
  0x6c   :  { %676 = vmatmul.f32.gmra.mxu0 %v1506_v18  ;;  %718 = vmatmul.f32.vlgmr.msra.gmra.mxu1 %v526_v4 }
  0x70   :  { %788 = vmatmul.f32.gmra.mxu2 %v1486_v50 }
  0x72   :  { %830 = vmatmul.f32.gmra.mxu3 %v1486_v50 }
  0x74   :  { %681 = vmatmul.f32.gmra.mxu0 %v1535_v7  ;;  %724 = vmatmul.f32.gmra.mxu1 %v534_v46 }
  0x78   :  { %792 = vmatmul.f32.gmra.mxu2 %v1519_v48 }
  0x7a   :  { %834 = vmatmul.f32.gmra.mxu3 %v1519_v48 }
  0x7c   :  { %686 = vmatmul.f32.gmra.mxu0 %v549_v38  ;;  %730 = vmatmul.f32.gmra.mxu1 %v542_v56 }
  0x80   :  { %796 = vmatmul.f32.gmra.mxu2 %v1548_v36 }
  0x82   :  { %838 = vmatmul.f32.gmra.mxu3 %v1548_v36 }
  0x84   :  { %736 = vmatmul.f32.gmra.mxu1 %v550_v57 }
  0xa0   :  { %v103_v41 = vpop.f32.mrf.mxu0 }
  0xa1   :  { %v104_v34 = vadd.f32 %v969_v10, %v103_v41 }
  0xa8   :  { %v228_v55 = vpop.f32.mrf.mxu1 }
  0xa9   :  { %v111_v45 = vpop.f32.mrf.mxu0  ;;  %v229_v60 = vadd.f32 %v228_v55, %v104_v34 }
  0xaa   :  { %v294_v12 = vpop.f32.mrf.mxu2  ;;  %v348_v14 = vpop.f32.mrf.mxu3  ;;  %v112_v17 = vadd.f32 %v969_v10, %v111_v45 }
  0xab   :  { %v295_v30 = vadd.f32 %v294_v12, %v229_v60 }
  0xad   :  { %v349_v50 = vadd.f32 %v348_v14, %v295_v30 }
  0xb0   :  { %v232_v23 = vpop.f32.mrf.mxu1 }
  0xb1   :  { %v119_v44 = vpop.f32.mrf.mxu0  ;;  %v233_v21 = vadd.f32 %v232_v23, %v112_v17 }
  0xb2   :  { %v299_v24 = vpop.f32.mrf.mxu2  ;;  %v120_v39 = vadd.f32 %v969_v10, %v119_v44 }
  0xb3   :  { %v354_v47 = vpop.f32.mrf.mxu3  ;;  %v300_v27 = vadd.f32 %v299_v24, %v233_v21 }
  0xb5   :  { %v355_v9 = vadd.f32 %v354_v47, %v300_v27 }
  0xb8   :  { %v236_v49 = vpop.f32.mrf.mxu1 }
  0xb9   :  { %v127_v16 = vpop.f32.mrf.mxu0  ;;  %v237_v43 = vadd.f32 %v236_v49, %v120_v39 }
  0xba   :  { %v304_v61 = vpop.f32.mrf.mxu2  ;;  %v128_v54 = vadd.f32 %v969_v10, %v127_v16 }
  0xbb   :  { %v305_v53 = vadd.f32 %v304_v61, %v237_v43 }
  0xbc   :  { %v360_v22 = vpop.f32.mrf.mxu3 }
  0xbd   :  { %v361_v13 = vadd.f32 %v360_v22, %v305_v53 }
  0xc1   :  { %v240_v26 = vpop.f32.mrf.mxu1  ;;  %v435_v5 = vpop.f32.mrf.mxu0 }
  0xc2   :  { %v309_v62 = vpop.f32.mrf.mxu2  ;;  %v436_v1 = vadd.f32 %v435_v5, %v349_v50  ;;  %v241_v0 = vadd.f32 %v240_v26, %v128_v54 }
  0xc4   :  { %v310_v25 = vadd.f32 %v309_v62, %v241_v0 }
  0xc5   :  { %v366_v28 = vpop.f32.mrf.mxu3 }
  0xc6   :  { %v367_v44 = vadd.f32 %v366_v28, %v310_v25 }
  0xc9   :  { %v439_v6 = vpop.f32.mrf.mxu0  ;;  %v484_v19 = vpop.f32.mrf.mxu1 }
  0xca   :  { %v485_v29 = vadd.f32 %v484_v19, %v436_v1  ;;  %v440_v48 = vadd.f32 %v439_v6, %v355_v9 }
  0xcb   :  { %v530_v33 = vpop.f32.mrf.mxu2 }
  0xcc   :  { %v531_v35 = vadd.f32 %v530_v33, %v485_v29 }
  0xcd   :  { %v620_v42 = vpop.f32.mrf.mxu3 }
  0xce   :  { %v621_v7 = vadd.f32 %v620_v42, %v531_v35 }
  0xd1   :  { %v443_v3 = vpop.f32.mrf.mxu0  ;;  %v488_v11 = vpop.f32.mrf.mxu1 }
  0xd2   :  { %v489_v58 = vadd.f32 %v488_v11, %v440_v48  ;;  %v444_v32 = vadd.f32 %v443_v3, %v361_v13 }
  0xd3   :  { %v538_v52 = vpop.f32.mrf.mxu2 }
  0xd4   :  { %v539_v38 = vadd.f32 %v538_v52, %v489_v58 }
  0xd5   :  { %v624_v8 = vpop.f32.mrf.mxu3 }
  0xd6   :  { %v625_v41 = vadd.f32 %v624_v8, %v539_v38 }
  0xd9   :  { %v447_v59 = vpop.f32.mrf.mxu0  ;;  %v492_v4 = vpop.f32.mrf.mxu1 }
  0xda   :  { %v493_v55 = vadd.f32 %v492_v4, %v444_v32  ;;  %v448_v61 = vadd.f32 %v447_v59, %v367_v44 }
  0xdb   :  { %v546_v15 = vpop.f32.mrf.mxu2 }
  0xdc   :  { %v547_v24 = vadd.f32 %v546_v15, %v493_v55 }
  0xdd   :  { %v628_v20 = vpop.f32.mrf.mxu3 }
  0xde   :  { %v629_v5 = vadd.f32 %v628_v20, %v547_v24  ;;  %v970_v24 = vld [vmem:[%s1652_s2 + $0x1] ss:$0 sm:$0xff] }
  0xe1   :  { %v496_v18 = vpop.f32.mrf.mxu1  ;;  %v672_v40 = vpop.f32.mrf.mxu0 }
  0xe2   :  { %v673_v63 = vadd.f32 %v672_v40, %v621_v7  ;;  %v497_v62 = vadd.f32 %v496_v18, %v448_v61 }
  0xe3   :  { %v554_v46 = vpop.f32.mrf.mxu2 }
  0xe4   :  { %v555_v28 = vadd.f32 %v554_v46, %v497_v62 }
  0xe5   :  { %v632_v51 = vpop.f32.mrf.mxu3 }
  0xe6   :  { %v633_v52 = vadd.f32 %v632_v51, %v555_v28 }
  0xe9   :  { %v677_v56 = vpop.f32.mrf.mxu0  ;;  %v719_v36 = vpop.f32.mrf.mxu1 }
  0xea   :  { %v720_v31 = vadd.f32 %v719_v36, %v673_v63  ;;  %v678_v12 = vadd.f32 %v677_v56, %v625_v41 }
  0xeb   :  { %v785_v2 = vpop.f32.mrf.mxu2 }
  0xec   :  { %v786_v57 = vadd.f32 %v785_v2, %v720_v31 }
  0xed   :  { %v827_v37 = vpop.f32.mrf.mxu3 }
  0xee   :  { %v1617_v45 = vadd.f32 %v827_v37, %v786_v57 }
  0xf0   :  { %842 = vadd.xlane.f32.xlu0 %v1617_v45  ;;  %v854_v14 = vmul.f32 %v1617_v45, %v1617_v45 }
  0xf1   :  { %v725_v23 = vpop.f32.mrf.mxu1  ;;  %v682_v16 = vpop.f32.mrf.mxu0 }
  0xf2   :  { %v726_v47 = vadd.f32 %v725_v23, %v678_v12  ;;  %858 = vadd.xlane.f32.xlu2 %v854_v14  ;;  %v683_v19 = vadd.f32 %v682_v16, %v629_v5  ;;  %v971_v16 = vld [vmem:[%s1652_s2 + $0x2] ss:$0 sm:$0xff]  ;;  %s1006_s2 = smov [#allocation2]  }
  0xf3   :  { %v789_v49 = vpop.f32.mrf.mxu2  ;;  %s952_s28 = sshll.u32 %s1006_s2, 4  ;;  %s953_s28 = int_to_ptr.vmem [resolvable:$true] %s952_s28 }
  0xf4   :  { %v790_v22 = vadd.f32 %v789_v49, %v726_v47 }
  0xf5   :  { %v831_v26 = vpop.f32.mrf.mxu3 }
  0xf6   :  { %v1622_v6 = vadd.f32 %v831_v26, %v790_v22 }
  0xf8   :  { %844 = vadd.xlane.f32.xlu0 %v1622_v6  ;;  %v855_v10 = vmul.f32 %v1622_v6, %v1622_v6 }
  0xf9   :  { %v731_v33 = vpop.f32.mrf.mxu1  ;;  %v687_v11 = vpop.f32.mrf.mxu0 }
  0xfa   :  { %v732_v42 = vadd.f32 %v731_v33, %v683_v19  ;;  %860 = vadd.xlane.f32.xlu2 %v855_v10  ;;  %v688_v17 = vadd.f32 %v687_v11, %v633_v52 }
  0xfb   :  { %v793_v34 = vpop.f32.mrf.mxu2 }
  0xfc   :  { %v794_v3 = vadd.f32 %v793_v34, %v732_v42 }
  0xfd   :  { %v835_v60 = vpop.f32.mrf.mxu3 }
  0xfe   :  { %v1627_v8 = vadd.f32 %v835_v60, %v794_v3 }
 0x100   :  { %846 = vadd.xlane.f32.xlu1 %v1627_v8  ;;  %v856_v30 = vmul.f32 %v1627_v8, %v1627_v8 }
 0x101   :  { %v737_v59 = vpop.f32.mrf.mxu1 }
 0x102   :  { %v738_v4 = vadd.f32 %v737_v59, %v688_v17  ;;  %862 = vadd.xlane.f32.xlu0 %v856_v30 }
 0x103   :  { %v797_v50 = vpop.f32.mrf.mxu2 }
 0x104   :  { %v798_v21 = vadd.f32 %v797_v50, %v738_v4 }
 0x105   :  { %v839_v15 = vpop.f32.mrf.mxu3 }
 0x106   :  { %v1632_v1 = vadd.f32 %v839_v15, %v798_v21 }
 0x108   :  { %848 = vadd.xlane.f32.xlu1 %v1632_v1  ;;  %v857_v20 = vmul.f32 %v1632_v1, %v1632_v1 }
 0x110   :  { %864 = vadd.xlane.f32.xlu1 %v857_v20 }
 0x163   :  { %v843_v39 = vpop.xlane.xlu0 %842 }
 0x164   :  { %v850_v27 = vmul.f32 0.03125, %v843_v39 }
 0x165   :  { %v859_v29 = vpop.xlane.xlu2 %858 }
 0x166   :  { %v870_v18 = vmul.f32 %v850_v27, %v850_v27  ;;  %v866_v40 = vmul.f32 0.03125, %v859_v29  ;;  %v882_v44 = vsub.f32 %v1617_v45, %v850_v27 }
 0x168   :  { %v874_v9 = vsub.f32 %v866_v40, %v870_v18 }
 0x16a   :  { %v878_v43 = vmax.f32 %v874_v9, 0.0 }
 0x16b   :  { %v845_v35 = vpop.xlane.xlu0 %844 }
 0x16c   :  { %v886_v46 = vadd.f32 1e-05, %v878_v43  ;;  %v851_v48 = vmul.f32 0.03125, %v845_v35 }
 0x16d   :  { %v861_v51 = vpop.xlane.xlu2 %860 }
 0x16e   :  { %972 = vrsqrt.f32 %v886_v46  ;;  %v871_v54 = vmul.f32 %v851_v48, %v851_v48  ;;  %v867_v53 = vmul.f32 0.03125, %v861_v51  ;;  %vm896_vm2 = vweird.f32 %v886_v46 }
 0x16f   :  { %v883_v60 = vsub.f32 %v1622_v6, %v851_v48 }
 0x170   :  { %v875_v7 = vsub.f32 %v867_v53, %v871_v54 }
 0x172   :  { %v879_v58 = vmax.f32 %v875_v7, 0.0 }
 0x173   :  { %v847_v63 = vpop.xlane.xlu1 %846 }
 0x174   :  { %v973_v56 = vpop.eup %972  ;;  %v852_v36 = vmul.f32 0.03125, %v847_v63  ;;  %v887_v0 = vadd.f32 1e-05, %v879_v58 }
 0x175   :  { %v891_v13 = vmul.f32 %v973_v56, %v886_v46  ;;  %v863_v38 = vpop.xlane.xlu0 %862  ;;  %vm897_vm1 = vweird.f32 %v973_v56 }
 0x176   :  { %v872_v31 = vmul.f32 %v852_v36, %v852_v36  ;;  %v868_v2 = vmul.f32 0.03125, %v863_v38  ;;  %974 = vrsqrt.f32 %v887_v0  ;;  %vm898_vm3 = vmor %vm896_vm2, %vm897_vm1  ;;  %vm906_vm5 = vweird.f32 %v887_v0 }
 0x177   :  { %v892_v32 = vmul.f32 %v973_v56, %v891_v13  ;;  %v884_v27 = vsub.f32 %v1627_v8, %v852_v36 }
 0x178   :  { %v876_v57 = vsub.f32 %v868_v2, %v872_v31 }
 0x179   :  { %v893_v37 = vmul.f32 0.5, %v892_v32 }
 0x17a   :  { %v880_v25 = vmax.f32 %v876_v57, 0.0 }
 0x17b   :  { %v894_v41 = vsub.f32 1.5, %v893_v37  ;;  %v849_v55 = vpop.xlane.xlu1 %848 }
 0x17c   :  { %v888_v12 = vadd.f32 1e-05, %v880_v25  ;;  %v975_v14 = vpop.eup %974  ;;  %v853_v26 = vmul.f32 0.03125, %v849_v55 }
 0x17d   :  { %v895_v23 = vmul.f32 %v973_v56, %v894_v41  ;;  %v901_v47 = vmul.f32 %v975_v14, %v887_v0  ;;  %vm907_vm4 = vweird.f32 %v975_v14 }
 0x17e   :  { %976 = vrsqrt.f32 %v888_v12  ;;  %v873_v28 = vmul.f32 %v853_v26, %v853_v26  ;;  %vm908_vm6 = vmor %vm906_vm5, %vm907_vm4  ;;  %vm916_vm8 = vweird.f32 %v888_v12  ;;  %v885_v54 = vsub.f32 %v1632_v1, %v853_v26 }
 0x17f   :  { %v899_v49 = vsel %vm898_vm3, %v973_v56, %v895_v23  ;;  %v902_v22 = vmul.f32 %v975_v14, %v901_v47 }
 0x180   :  { %v930_v61 = vmul.f32 %v899_v49, %v882_v44 }
 0x181   :  { %v903_v62 = vmul.f32 0.5, %v902_v22 }
 0x182   :  { %v935_v5 = vmul.f32 %v970_v24, %v930_v61 }
 0x183   :  { %v865_v19 = vpop.xlane.xlu1 %864  ;;  %v904_v33 = vsub.f32 1.5, %v903_v62 }
 0x184   :  { %v977_v45 = vpop.eup %976  ;;  %v940_v10 = vadd.f32 %v971_v16, %v935_v5  ;;  %v869_v42 = vmul.f32 0.03125, %v865_v19 }
 0x185   :  { %v911_v34 = vmul.f32 %v977_v45, %v888_v12  ;;  %v905_v3 = vmul.f32 %v975_v14, %v904_v33  ;;  %vm917_vm7 = vweird.f32 %v977_v45 }
 0x186   :  { %944 = vst [vmem:[#allocation2] sm:$0xff] %v940_v10  ;;  %v877_v11 = vsub.f32 %v869_v42, %v873_v28  ;;  %vm918_vm9 = vmor %vm916_vm8, %vm917_vm7 }
 0x187   :  { %v912_v52 = vmul.f32 %v977_v45, %v911_v34  ;;  %v909_v17 = vsel %vm908_vm6, %v975_v14, %v905_v3 }
 0x188   :  { %v881_v30 = vmax.f32 %v877_v11, 0.0  ;;  %v931_v59 = vmul.f32 %v909_v17, %v883_v60 }
 0x189   :  { %v913_v4 = vmul.f32 0.5, %v912_v52 }
 0x18a   :  { %v889_v50 = vadd.f32 1e-05, %v881_v30  ;;  %v936_v21 = vmul.f32 %v970_v24, %v931_v59 }
 0x18b   :  { %v914_v15 = vsub.f32 1.5, %v913_v4 }
 0x18c   :  { %978 = vrsqrt.f32 %v889_v50  ;;  %v941_v20 = vadd.f32 %v971_v16, %v936_v21  ;;  %vm926_vm11 = vweird.f32 %v889_v50 }
 0x18d   :  { %v915_v39 = vmul.f32 %v977_v45, %v914_v15 }
 0x18e   :  { %945 = vst [vmem:[#allocation2 + $0x8] sm:$0xff] %v941_v20 }
 0x18f   :  { %v919_v29 = vsel %vm918_vm9, %v977_v45, %v915_v39 }
 0x190   :  { %v932_v6 = vmul.f32 %v919_v29, %v884_v27 }
 0x192   :  { %v979_v18 = vpop.eup %978  ;;  %v937_v40 = vmul.f32 %v970_v24, %v932_v6 }
 0x193   :  { %v921_v9 = vmul.f32 %v979_v18, %v889_v50  ;;  %vm927_vm10 = vweird.f32 %v979_v18 }
 0x194   :  { %v942_v43 = vadd.f32 %v971_v16, %v937_v40  ;;  %vm928_vm12 = vmor %vm926_vm11, %vm927_vm10 }
 0x195   :  { %v922_v35 = vmul.f32 %v979_v18, %v921_v9 }
 0x196   :  { %946 = vst [vmem:[#allocation2 + $0x10] sm:$0xff] %v942_v43 }
 0x197   :  { %v923_v46 = vmul.f32 0.5, %v922_v35 }
 0x199   :  { %v924_v48 = vsub.f32 1.5, %v923_v46 }
 0x19b   :  { %v925_v51 = vmul.f32 %v979_v18, %v924_v48 }
 0x19d   :  { %v929_v53 = vsel %vm928_vm12, %v979_v18, %v925_v51 }
 0x19e   :  { %v933_v8 = vmul.f32 %v929_v53, %v885_v54 }
 0x1a0   :  { %v938_v7 = vmul.f32 %v970_v24, %v933_v8 }
 0x1a2   :  { %v943_v58 = vadd.f32 %v971_v16, %v938_v7 }
 0x1a4   :  { %947 = vst [vmem:[#allocation2 + $0x18] sm:$0xff] %v943_v58 }
 0x1a5   :  { %960 = dma.vmem_to_hbm [thread:$0]  %s953_s28, 512, %s955_s4, [#allocation3], %s1007_s5, %s1007_s5, %s1008_s6  }
 0x1a6   :  { %1004 = dma.done.wait [#allocation3], 512  }
 0x1a7   :  { %1005 = vsyncadd [#allocation3], 4294966784 }
 0x1a8   :  { %965 = vsyncpa [#allocation3], 1 }

</bundles_post_ra>
